<compile_context>
chip_gen: v6e
topology: v6e:2x2x1
jax: 0.10.0
libtpu: 0.0.40
codegen_flags: <defaults>
</compile_context>

<pallas_src>
import math

import jax
import jax.numpy as jnp
from jax.experimental import pallas as pl
from jax.experimental.pallas import tpu as pltpu

_MIB = 1024 * 1024
_H1, _H2, _H3 = 2048, 1024, 512          # fixed hidden widths of the module


# --------------------------------------------------------------------------- #
# small utilities
# --------------------------------------------------------------------------- #

def _vmem_capacity_bytes():
    """Physical VMEM per TensorCore (128 MiB on v5e/v6e, 64 MiB on v7x)."""
    try:
        return int(pltpu.get_tpu_info().vmem_capacity_bytes)
    except Exception:          # pragma: no cover -- version dependent
        return 64 * _MIB       # conservative: assume the smallest generation


def _vmem_limit_bytes(requested):
    cap = _vmem_capacity_bytes()
    return int(min(0.9 * cap, max(32 * _MIB, requested)))


def _fit_tile(total, preferred, unit):
    """Largest tile <= preferred that divides `total` and is a multiple of `unit`."""
    assert total % unit == 0, (total, unit)
    t = min(preferred, total)
    t -= t % unit
    while total % t:
        t -= unit
    return t


# Version gate for single-buffered grid-invariant operands (pl.Buffered(1)).
# Cached so a rejected construct is probed at most once; the fallback only
# changes buffering depth, never the output layout.
_SINGLE_BUFFER = {"ok": None}


def _single_buffer_supported():
    if _SINGLE_BUFFER["ok"] is None:
        ok = hasattr(pl, "Buffered")
        if ok:
            try:
                pl.BlockSpec((8, 128), lambda i, j: (0, 0),
                             pipeline_mode=pl.Buffered(1))
            except Exception:  # pragma: no cover -- version dependent
                ok = False
        _SINGLE_BUFFER["ok"] = ok
    return _SINGLE_BUFFER["ok"]


# --------------------------------------------------------------------------- #
# Kernel 1: cam_fc1 residual  f_res = f - relu(f @ Wc1 + bc1)
# Full-K LHS blocks (no K grid axis, no accumulator); (i, j) grid over
# row blocks x weight-column blocks, both "parallel".
# --------------------------------------------------------------------------- #

def _cam_residual_kernel(f_lhs_ref, f_row_ref, wc1_ref, bc1_ref, fres_ref):
    cam = jnp.dot(f_lhs_ref[...].astype(wc1_ref.dtype), wc1_ref[...],
                  preferred_element_type=jnp.float32)
    cam = jnp.maximum(cam + bc1_ref[...], 0.0)
    fres_ref[...] = (f_row_ref[...] - cam).astype(fres_ref.dtype)


def _cam_residual(f, wc1_cd, bc1, *, tm, tn, out_dtype):
    n, d = f.shape
    cdb = wc1_cd.dtype.itemsize
    req = int(1.4 * (2 * 4 * tm * d            # full-K row block (double-buffered)
                     + 2 * cdb * d * tn        # weight column block
                     + 2 * 4 * tm * tn         # residual input block
                     + 2 * jnp.dtype(out_dtype).itemsize * tm * tn
                     + cdb * tm * d            # in-kernel cast copy
                     + 4 * tm * tn))           # cam f32
    return pl.pallas_call(
        _cam_residual_kernel,
        out_shape=jax.ShapeDtypeStruct((n, d), out_dtype),
        grid=(n // tm, d // tn),
        in_specs=[
            pl.BlockSpec((tm, d), lambda i, j: (i, 0)),    # f rows (full K, invariant in j)
            pl.BlockSpec((tm, tn), lambda i, j: (i, j)),   # f again, residual columns
            pl.BlockSpec((d, tn), lambda i, j: (0, j)),    # cam_fc1 weight columns
            pl.BlockSpec((1, tn), lambda i, j: (0, j)),    # cam_fc1 bias
        ],
        out_specs=pl.BlockSpec((tm, tn), lambda i, j: (i, j)),
        compiler_params=pltpu.CompilerParams(
            dimension_semantics=("parallel", "parallel"),
            vmem_limit_bytes=_vmem_limit_bytes(req)),
    )(f, f, wc1_cd, bc1)


# --------------------------------------------------------------------------- #
# Kernel 2: pairwise |fi - fj| -> fc1/fc2/fc3 -> sim_fc -> sigmoid affinity
# 2-D (i, j) grid; fc1 K-chunked with an f32 VMEM accumulator.
# --------------------------------------------------------------------------- #

def _make_pairwise_kernel(dk):
    def kernel(fq_ref, fk_ref, w1_ref, b1_ref, w2_ref, b2_ref, w3_ref, b3_ref,
               ws_ref, bs_ref, out_ref, acc_ref):
        ti, d = fq_ref.shape
        tj = fk_ref.shape[0]
        m = ti * tj
        cd = w1_ref.dtype

        # fc1 over the pairwise |difference| slab, K-chunked so only an
        # (M, dk) dist chunk is ever live (peak VMEM independent of D and N).
        acc_ref[...] = jnp.zeros_like(acc_ref)
        for c in range(d // dk):                            # static trip count
            fq = fq_ref[:, pl.ds(c * dk, dk)]               # (ti, dk)
            fk = fk_ref[:, pl.ds(c * dk, dk)]               # (tj, dk)
            dist = jnp.abs(fk[None, :, :] - fq[:, None, :]).reshape(m, dk)
            acc_ref[...] += jnp.dot(dist.astype(cd),
                                    w1_ref[pl.ds(c * dk, dk), :],
                                    preferred_element_type=jnp.float32)

        # fc1 / fc2: fused relu + downcast so the f32 slabs die immediately;
        # accumulation stays f32 via preferred_element_type.
        h = jnp.maximum(acc_ref[...] + b1_ref[...], 0.0).astype(cd)
        h = jnp.maximum(jnp.dot(h, w2_ref[...], preferred_element_type=jnp.float32)
                        + b2_ref[...], 0.0).astype(cd)
        h = jnp.maximum(jnp.dot(h, w3_ref[...], preferred_element_type=jnp.float32)
                        + b3_ref[...], 0.0)                 # (m, 512) f32

        # sim_fc (512 -> 1) as a VPU multiply + lane reduction; yields the
        # lane-dense (ti, tj) output tile directly (no 1-column MXU matmul).
        hw = h.reshape(ti, tj, h.shape[-1]) * ws_ref[...]
        logit = jnp.sum(hw, axis=-1) + bs_ref[...]
        out_ref[...] = jax.nn.sigmoid(logit)

    return kernel


def _pairwise_mlp(f_res, operands, *, tile_i, tile_j, dk):
    n, d = f_res.shape
    m = tile_i * tile_j
    cd_bytes = operands[0].dtype.itemsize
    fb = f_res.dtype.itemsize

    req = int(1.4 * (
        cd_bytes * (d * _H1 + _H1 * _H2 + _H2 * _H3)       # resident weights
        + 4 * (_H1 + _H2 + 2 * _H3 + 1)                    # biases + sim_fc row
        + 2 * fb * d * (tile_i + tile_j)                   # streamed f_res tiles
        + 4 * m * _H1                                      # fc1 accumulator
        + cd_bytes * m * (dk + _H1 + _H2)                  # dist chunk + h1/h2 (cd)
        + 4 * m * (_H2 + 2 * _H3)                          # f32 dot outputs + h3
        + 2 * 4 * m))                                      # output tiles

    cost = pl.CostEstimate(
        flops=int(2 * n * n * (d * _H1 + _H1 * _H2 + _H2 * _H3 + _H3)),
        transcendentals=int(n * n),
        bytes_accessed=int(cd_bytes * (d * _H1 + _H1 * _H2 + _H2 * _H3)
                           + fb * n * d * (1 + n // tile_i) + 4 * n * n))

    const = lambda i, j: (0, 0)

    def call(single_buffer):
        if single_buffer:
            inv = lambda shape: pl.BlockSpec(shape, const,
                                             pipeline_mode=pl.Buffered(1))
        else:
            inv = lambda shape: pl.BlockSpec(shape, const)
        in_specs = [
            pl.BlockSpec((tile_i, d), lambda i, j: (i, 0)),   # query rows
            pl.BlockSpec((tile_j, d), lambda i, j: (j, 0)),   # key rows
        ] + [inv(x.shape) for x in operands]                  # weights / biases
        return pl.pallas_call(
            _make_pairwise_kernel(dk),
            out_shape=jax.ShapeDtypeStruct((n, n), jnp.float32),
            grid=(n // tile_i, n // tile_j),
            in_specs=in_specs,
            out_specs=pl.BlockSpec((tile_i, tile_j), lambda i, j: (i, j)),
            scratch_shapes=[pltpu.VMEM((m, _H1), jnp.float32)],
            compiler_params=pltpu.CompilerParams(
                dimension_semantics=("parallel", "parallel"),
                vmem_limit_bytes=_vmem_limit_bytes(req)),
            cost_estimate=cost,
        )(f_res, f_res, *operands)

    if _single_buffer_supported():
        try:
            return call(True)
        except Exception:      # pragma: no cover -- version dependent
            _SINGLE_BUFFER["ok"] = False   # cache: skip the failing compile next time
    return call(False)


# --------------------------------------------------------------------------- #
# Wrapper
# --------------------------------------------------------------------------- #

def mct_forward(f, params, *, tile_i=8, tile_j=None, compute_dtype=jnp.bfloat16):
    """Eval-mode MCT forward: returns the (N, N) affinity map."""
    n, d = f.shape
    assert d % 128 == 0, "feature dim must be a multiple of 128"
    cd = jnp.dtype(compute_dtype)

    # Tile budget per generation: M = tile_i*tile_j ~1024 rows on 64 MiB VMEM
    # (v7x), ~2048 rows on 128 MiB (v5e/v6e); dk bounds the live dist chunk.
    if tile_j is None:
        tile_j = 128 if _vmem_capacity_bytes() <= 96 * _MIB else 256
    assert tile_i % 8 == 0 and tile_j % 128 == 0

    # Pad the tracklet axis so every output block is lane-dense (tile_j is a
    # multiple of 128). Padded rows/cols are sliced off at the end and never
    # contaminate valid entries (A[i, j] reads only rows i and j of f_res).
    blk = (tile_i * tile_j) // math.gcd(tile_i, tile_j)
    n_pad = ((n + blk - 1) // blk) * blk
    f_pad = f if n_pad == n else jnp.pad(f, ((0, n_pad - n), (0, 0)))

    # Cast the big matmul weights once; biases / accumulation stay f32.
    wc1 = params["wc1"].astype(cd)
    w1 = params["w1"].astype(cd)
    w2 = params["w2"].astype(cd)
    w3 = params["w3"].astype(cd)
    ws_row = jnp.reshape(params["ws"], (1, -1)).astype(jnp.float32)

    # ---- kernel 1: cam_fc1 residual (full-K blocks, chunky grid steps);
    #      f_res is emitted in the compute dtype to halve writeback / re-read.
    tm = _fit_tile(n_pad, 256, 8)
    tn = _fit_tile(d, 512, 128)
    f_res = _cam_residual(f_pad, wc1, params["bc1"], tm=tm, tn=tn, out_dtype=cd)

    # ---- kernel 2: pairwise |fi - fj| MLP -> sigmoid affinity
    dk = _fit_tile(d, 512, 128)
    operands = (w1, params["b1"], w2, params["b2"], w3, params["b3"],
                ws_row, params["bs"])
    a = _pairwise_mlp(f_res, operands, tile_i=tile_i, tile_j=tile_j, dk=dk)
    return a if n_pad == n else a[:n, :n]


# --------------------------- parameter init -------------------------------- #

def init_params(key, dim):
    """Deterministic synthetic init mirroring the PyTorch module:
       kaiming_normal_(mode='fan_out', a=0) -> std = sqrt(2 / out_features),
       classifier init -> std = 0.001, all biases zero.
       PyTorch Linear weight is (out, in); we store the transpose (in, out)
       so the kernel computes x @ W.
    """
    ks = jax.random.split(key, 6)

    def kaiming(k, out_f, in_f):
        w = jax.random.normal(k, (out_f, in_f), jnp.float32) * jnp.sqrt(2.0 / out_f)
        return jnp.transpose(w)  # (in, out)

    return {
        "w1": kaiming(ks[0], _H1, dim),
        "b1": jnp.zeros((1, _H1), jnp.float32),
        "w2": kaiming(ks[1], _H2, _H1),
        "b2": jnp.zeros((1, _H2), jnp.float32),
        "w3": kaiming(ks[2], _H3, _H2),
        "b3": jnp.zeros((1, _H3), jnp.float32),
        "ws": kaiming(ks[3], 1, _H3),
        "bs": jnp.zeros((1, 1), jnp.float32),
        "wc1": kaiming(ks[4], dim, dim),
        "bc1": jnp.zeros((1, dim), jnp.float32),
        # cam_fc2 (classifier init) -- only consumed in training mode.
        "wc2": jnp.transpose(
            jax.random.normal(ks[5], (36, dim), jnp.float32) * 0.001),
        "bc2": jnp.zeros((1, 36), jnp.float32),
    }


# ------------------------------ reference ---------------------------------- #

def mct_forward_ref(f, params, compute_dtype=None):
    """Pure-JAX reference. If compute_dtype is given, matmul operands (and the
    stored f_res) are cast to it with f32 accumulation, mirroring the kernel's
    precision path; sim_fc stays f32 as in the kernel."""

    def mm(x, w):
        if compute_dtype is None:
            return jnp.dot(x, w, preferred_element_type=jnp.float32)
        return jnp.dot(x.astype(compute_dtype), w.astype(compute_dtype),
                       preferred_element_type=jnp.float32)

    cam = jnp.maximum(mm(f, params["wc1"]) + params["bc1"], 0.0)
    f_res = f - cam
    if compute_dtype is not None:
        f_res = f_res.astype(compute_dtype)            # kernel stores f_res in cd
    dist = jnp.abs(f_res[None, :, :] - f_res[:, None, :])   # (N, N, D)
    h = jnp.maximum(mm(dist, params["w1"]) + params["b1"], 0.0)
    h = jnp.maximum(mm(h, params["w2"]) + params["b2"], 0.0)
    h = jnp.maximum(mm(h, params["w3"]) + params["b3"], 0.0)
    a = jax.nn.sigmoid(
        jnp.dot(h, params["ws"], preferred_element_type=jnp.float32) + params["bs"])
    return a[..., 0]


# -------------------------------- main ------------------------------------- #

if __name__ == "__main__":
    key = jax.random.PRNGKey(0)
    k_f, k_p = jax.random.split(key)

    N, DIM = 16, 256   # small demo shapes (module's nominal dim is 4096)
    f = jax.random.normal(k_f, (N, DIM), jnp.float32)
    params = init_params(k_p, DIM)

    # Optimized path: bf16 MXU operands, f32 accumulation. Validated against a
    # precision-matched (bf16-operand) reference.
    A_bf16 = jax.block_until_ready(
        mct_forward(f, params, compute_dtype=jnp.bfloat16))
    assert A_bf16.shape == (N, N), A_bf16.shape
    assert bool(jnp.all(jnp.isfinite(A_bf16)))
    assert bool(jnp.all((A_bf16 >= 0.0) & (A_bf16 <= 1.0)))
    A_ref_bf16 = jax.block_until_ready(
        mct_forward_ref(f, params, compute_dtype=jnp.bfloat16))
    err_bf16 = float(jnp.max(jnp.abs(A_bf16 - A_ref_bf16)))
    assert err_bf16 < 5e-2, err_bf16

    # Full-f32 path validated against a default-precision f32 reference to
    # confirm module semantics are preserved.
    A_f32 = jax.block_until_ready(
        mct_forward(f, params, compute_dtype=jnp.float32))
    A_ref = jax.block_until_ready(mct_forward_ref(f, params))
    err_f32 = float(jnp.max(jnp.abs(A_f32 - A_ref)))
    assert err_f32 < 2e-2, err_f32

    print("KERNEL_OK")
</pallas_src>

<mosaic_0001>
module attributes {stable_mosaic.version = 11 : i64} {
  func.func @_cam_residual_kernel(%arg0: i32, %arg1: i32, %arg2: memref<128x256xf32, #tpu.memory_space<vmem>>, %arg3: memref<128x256xf32, #tpu.memory_space<vmem>>, %arg4: memref<256x256xbf16, #tpu.memory_space<vmem>>, %arg5: memref<1x256xf32, #tpu.memory_space<vmem>>, %arg6: memref<128x256xbf16, #tpu.memory_space<vmem>>) attributes {dimension_semantics = [#tpu.dimension_semantics<parallel>, #tpu.dimension_semantics<parallel>], iteration_bounds = array<i64: 1, 1>, scalar_prefetch = 0 : i64, scratch_operands = 0 : i64, tpu.core_type = #tpu.core_type<tc>, window_params = [{transform_indices = @transform_0, window_bounds = array<i64: 128, 256>}, {transform_indices = @transform_1, window_bounds = array<i64: 128, 256>}, {transform_indices = @transform_2, window_bounds = array<i64: 256, 256>}, {transform_indices = @transform_3, window_bounds = array<i64: 1, 256>}, {transform_indices = @transform_4, window_bounds = array<i64: 128, 256>}]} {
    %c0 = arith.constant 0 : index
    %c0_0 = arith.constant 0 : index
    %0 = vector.load %arg2[%c0, %c0_0] : memref<128x256xf32, #tpu.memory_space<vmem>>, vector<128x256xf32>
    %1 = arith.truncf %0 : vector<128x256xf32> to vector<128x256xbf16>
    %c0_1 = arith.constant 0 : index
    %c0_2 = arith.constant 0 : index
    %2 = vector.load %arg4[%c0_1, %c0_2] : memref<256x256xbf16, #tpu.memory_space<vmem>>, vector<256x256xbf16>
    %cst = arith.constant dense<0.000000e+00> : vector<128x256xf32>
    %3 = tpu.matmul %1, %2, %cst {dimension_numbers = #tpu.dot_dimension_numbers<[1], [0], [0], [1], [0, 0, 1, 1], [], []>} : vector<128x256xbf16>, vector<256x256xbf16>, vector<128x256xf32> -> vector<128x256xf32>
    %c0_3 = arith.constant 0 : index
    %c0_4 = arith.constant 0 : index
    %4 = vector.load %arg5[%c0_3, %c0_4] : memref<1x256xf32, #tpu.memory_space<vmem>>, vector<1x256xf32>
    %5 = vector.broadcast %4 : vector<1x256xf32> to vector<128x256xf32>
    %6 = arith.addf %3, %5 : vector<128x256xf32>
    %cst_5 = arith.constant 0.000000e+00 : f32
    %7 = vector.broadcast %cst_5 : f32 to vector<128x256xf32>
    %8 = arith.maximumf %6, %7 : vector<128x256xf32>
    %c0_6 = arith.constant 0 : index
    %c0_7 = arith.constant 0 : index
    %9 = vector.load %arg3[%c0_6, %c0_7] : memref<128x256xf32, #tpu.memory_space<vmem>>, vector<128x256xf32>
    %10 = arith.subf %9, %8 : vector<128x256xf32>
    %11 = arith.truncf %10 : vector<128x256xf32> to vector<128x256xbf16>
    %c0_8 = arith.constant 0 : index
    %c0_9 = arith.constant 0 : index
    %12 = vector.load %arg6[%c0_8, %c0_9] : memref<128x256xbf16, #tpu.memory_space<vmem>>, vector<128x256xbf16>
    tpu.vector_store %arg6[%c0_8, %c0_9], %11 {strides = array<i32>} : memref<128x256xbf16, #tpu.memory_space<vmem>>, vector<128x256xbf16>,
    return
  }
  func.func @transform_0(%arg0: i32, %arg1: i32) -> (i32, i32) {
    %c0_i32 = arith.constant 0 : i32
    %c0_i32_0 = arith.constant 0 : i32
    return %arg0, %c0_i32 : i32, i32
  }
  func.func @transform_1(%arg0: i32, %arg1: i32) -> (i32, i32) {
    %c0_i32 = arith.constant 0 : i32
    return %arg0, %arg1 : i32, i32
  }
  func.func @transform_2(%arg0: i32, %arg1: i32) -> (i32, i32) {
    %c0_i32 = arith.constant 0 : i32
    %c0_i32_0 = arith.constant 0 : i32
    return %c0_i32, %arg1 : i32, i32
  }
  func.func @transform_3(%arg0: i32, %arg1: i32) -> (i32, i32) {
    %c0_i32 = arith.constant 0 : i32
    %c0_i32_0 = arith.constant 0 : i32
    return %c0_i32, %arg1 : i32, i32
  }
  func.func @transform_4(%arg0: i32, %arg1: i32) -> (i32, i32) {
    %c0_i32 = arith.constant 0 : i32
    return %arg0, %arg1 : i32, i32
  }
}

</mosaic_0001>

<bundles_post_ra>
// kernel: tpu_custom_call.1
= control target key start
LH: loop header
LB: loop body
LE: loop exit
PB: predicated region body
PF: predicated region fallthrough
CT: control target
= control target key end

     0   :  { %9 = vsyncpa [#allocation3], 0  ;;  %s978_s0 = inlined_call_operand.hbm [shape: f32[128,256], index: 0, kind: input, shape index: {}]   ;;  %s979_s1 = inlined_call_operand.hbm [shape: f32[128,256], index: 1, kind: input, shape index: {}]   ;;  %s980_s2 = inlined_call_operand.hbm [shape: bf16[256,256], index: 2, kind: input, shape index: {}]   ;;  %s981_s3 = inlined_call_operand.vmem [shape: f32[1,256], index: 3, kind: input, shape index: {}]   ;;  %s982_s4 = inlined_call_operand.hbm [shape: bf16[128,256], index: 4, kind: output, shape index: {}]  }
   0x1   :  { %10 = vsyncpa [#allocation6], 0 }
   0x2   :  { %11 = vsyncpa [#allocation4], 0  ;;  %s888_s15 = smov [#allocation5]   ;;  %s889_s17 = smov [#allocation2]  }
   0x3   :  { %s29_s16 = sshll.u32 %s888_s15, 4  ;;  %s17_s18 = sshll.u32 %s889_s17, 4  ;;  %s30_s16 = int_to_ptr.vmem [resolvable:$true] %s29_s16  ;;  %s18_s18 = int_to_ptr.vmem [resolvable:$true] %s17_s18 }
   0x4   :  { %s810_s19 = scalar_lea.vmem %s30_s16, 4096  ;;  %p815_p1 = scmp.lt.s32.totalorder %s30_s16, %s30_s16 }
   0x5   :  { %p811_p0 = scmp.ne.s32.totalorder %s30_s16, %s810_s19  ;;  %p816_p2 = scmp.lt.s32.totalorder %s810_s19, %s810_s19 }
   0x7   :  { %p817_p3 = por %p816_p2, %p815_p1 }
   0x9   :  { %p818_p4 = pnand %p817_p3, %p811_p0 }
   0xb   :  { %821 = shalt.err (!%p818_p4)
}
   0xc   :  { %s890_s20 = smov 256   ;;  %s891_s21 = smov 16  }
   0xd   :  { %35 = dma.hbm_to_vmem [thread:$0]  %s979_s1, 4096, %s30_s16, [#allocation6], %s890_s20, %s890_s20, %s891_s21  }
   0xe   :  { %s830_s24 = scalar_lea.vmem %s18_s18, 4096  ;;  %p835_p6 = scmp.lt.s32.totalorder %s18_s18, %s18_s18 }
   0xf   :  { %p831_p5 = scmp.ne.s32.totalorder %s18_s18, %s830_s24  ;;  %p836_p7 = scmp.lt.s32.totalorder %s830_s24, %s830_s24 }
  0x11   :  { %p837_p8 = por %p836_p7, %p835_p6 }
  0x13   :  { %p838_p9 = pnand %p837_p8, %p831_p5 }
  0x15   :  { %841 = shalt.err (!%p838_p9)
}
  0x16   :  { %23 = dma.hbm_to_vmem [thread:$0]  %s978_s0, 4096, %s18_s18, [#allocation3], %s890_s20, %s890_s20, %s891_s21  }
  0x17   :  { %s892_s27 = smov [#allocation7]  }
  0x18   :  { %s41_s28 = sshll.u32 %s892_s27, 4  ;;  %s42_s28 = int_to_ptr.vmem [resolvable:$true] %s41_s28 }
  0x19   :  { %s850_s29 = scalar_lea.vmem %s42_s28, 4096  ;;  %p855_p11 = scmp.lt.s32.totalorder %s42_s28, %s42_s28 }
  0x1a   :  { %p851_p10 = scmp.ne.s32.totalorder %s42_s28, %s850_s29  ;;  %p856_p12 = scmp.lt.s32.totalorder %s850_s29, %s850_s29 }
  0x1c   :  { %p857_p13 = por %p856_p12, %p855_p11 }
  0x1e   :  { %p858_p0 = pnand %p857_p13, %p851_p10 }
  0x20   :  { %861 = shalt.err (!%p858_p0)
}
  0x21   :  { %s893_s1 = smov 128   ;;  %s894_s30 = smov 8  }
  0x22   :  { %47 = dma.hbm_to_vmem [thread:$0]  %s980_s2, 4096, %s42_s28, [#allocation6], %s893_s1, %s893_s1, %s894_s30  }
  0x23   :  { %882 = dma.done.wait [#allocation3], 4096  }
  0x24   :  { %883 = vsyncadd [#allocation3], 4294963200 }
  0x25   :  { %884 = dma.done.wait [#allocation6], 8192  }
  0x26   :  { %885 = vsyncadd [#allocation6], 4294959104  ;;  %v754_v0 = vld [vmem:[#allocation7 + $0x74] ss:$8 sps:$4 sm:$0xff]   ;;  %v756_v1 = vld [vmem:[#allocation7 + $0x70] ss:$8 sps:$4 sm:$0xff]  }
  0x27   :  { %311 = vmatprep.subr.bf16.mxu0 %v754_v0  ;;  %714 = vmatprep.subr.bf16.mxu1 %v754_v0  ;;  %v757_v2 = vld [vmem:[#allocation7 + $0x64] ss:$8 sps:$4 sm:$0xff]   ;;  %v759_v3 = vld [vmem:[#allocation7 + $0x60] ss:$8 sps:$4 sm:$0xff]   ;;  %v760_v4 = vld [vmem:[#allocation7 + $0x54] ss:$8 sps:$4 sm:$0xff]  }
  0x28   :  { %312 = vmatpush1.bf16.msra.mxu0 %v756_v1  ;;  %730 = vmatpush1.bf16.msra.mxu1 %v756_v1  ;;  %v762_v5 = vld [vmem:[#allocation7 + $0x50] ss:$8 sps:$4 sm:$0xff]   ;;  %v763_v6 = vld [vmem:[#allocation7 + $0x44] ss:$8 sps:$4 sm:$0xff]   ;;  %v765_v7 = vld [vmem:[#allocation7 + $0x40] ss:$8 sps:$4 sm:$0xff]  }
  0x29   :  { %313 = vmatprep.subr.bf16.mxu0 %v757_v2  ;;  %715 = vmatprep.subr.bf16.mxu1 %v757_v2  ;;  %v766_v8 = vld [vmem:[#allocation7 + $0x34] ss:$8 sps:$4 sm:$0xff]   ;;  %v768_v9 = vld [vmem:[#allocation7 + $0x30] ss:$8 sps:$4 sm:$0xff]   ;;  %v769_v10 = vld [vmem:[#allocation7 + $0x24] ss:$8 sps:$4 sm:$0xff]  }
  0x2a   :  { %v771_v11 = vld [vmem:[#allocation7 + $0x20] ss:$8 sps:$4 sm:$0xff]   ;;  %v772_v12 = vld [vmem:[#allocation7 + $0x14] ss:$8 sps:$4 sm:$0xff]   ;;  %v774_v18 = vld [vmem:[#allocation7 + $0x10] ss:$8 sps:$4 sm:$0xff]  }
  0x2b   :  { %v60_v13 = vld [vmem:[#allocation2 + $0x8] sm:$0xff]  ;;  %v62_v14 = vld [vmem:[#allocation2 + $0x18] sm:$0xff]  ;;  %v59_v38 = vld [vmem:[#allocation2] sm:$0xff] }
  0x2c   :  { %314 = vmatpush1.bf16.msra.mxu0 %v759_v3  ;;  %731 = vmatpush1.bf16.msra.mxu1 %v759_v3  ;;  %v92_v15 = vpack.c.bf16 %v62_v14, %v60_v13  ;;  %v76_v16 = vld [vmem:[#allocation2 + $0x88] sm:$0xff]  ;;  %v78_v17 = vld [vmem:[#allocation2 + $0x98] sm:$0xff]  ;;  %v61_v39 = vld [vmem:[#allocation2 + $0x10] sm:$0xff] }
  0x2d   :  { %315 = vmatprep.subr.bf16.mxu0 %v760_v4  ;;  %716 = vmatprep.subr.bf16.mxu1 %v760_v4  ;;  %v100_v19 = vpack.c.bf16 %v78_v17, %v76_v16  ;;  %v775_v20 = vld [vmem:[#allocation7 + $0x4] ss:$8 sps:$4 sm:$0xff]   ;;  %v777_v21 = vld [vmem:[#allocation7] ss:$8 sps:$4 sm:$0xff]   ;;  %v778_v22 = vld [vmem:[#allocation7 + $0xf4] ss:$8 sps:$4 sm:$0xff]   ;;  %v91_v46 = vpack.c.bf16 %v61_v39, %v59_v38  ;;  %v141_v16 = vlaneseq }
  0x2e   :  { %343 = vmatprep.mubr.bf16.mxu0 %v92_v15  ;;  %v780_v23 = vld [vmem:[#allocation7 + $0xf0] ss:$8 sps:$4 sm:$0xff]   ;;  %v781_v24 = vld [vmem:[#allocation7 + $0xe4] ss:$8 sps:$4 sm:$0xff]   ;;  %v783_v25 = vld [vmem:[#allocation7 + $0xe0] ss:$8 sps:$4 sm:$0xff]  }
  0x2f   :  { %383 = vmatprep.mubr.bf16.mxu1 %v100_v19  ;;  %v784_v26 = vld [vmem:[#allocation7 + $0xd4] ss:$8 sps:$4 sm:$0xff]   ;;  %v786_v27 = vld [vmem:[#allocation7 + $0xd0] ss:$8 sps:$4 sm:$0xff]   ;;  %v787_v28 = vld [vmem:[#allocation7 + $0xc4] ss:$8 sps:$4 sm:$0xff]  }
  0x30   :  { %316 = vmatpush1.bf16.msra.mxu0 %v762_v5  ;;  %732 = vmatpush1.bf16.msra.mxu1 %v762_v5  ;;  %v789_v29 = vld [vmem:[#allocation7 + $0xc0] ss:$8 sps:$4 sm:$0xff]   ;;  %v790_v30 = vld [vmem:[#allocation7 + $0xb4] ss:$8 sps:$4 sm:$0xff]   ;;  %v792_v31 = vld [vmem:[#allocation7 + $0xb0] ss:$8 sps:$4 sm:$0xff]  }
  0x31   :  { %317 = vmatprep.subr.bf16.mxu0 %v763_v6  ;;  %717 = vmatprep.subr.bf16.mxu1 %v763_v6  ;;  %v793_v32 = vld [vmem:[#allocation7 + $0xa4] ss:$8 sps:$4 sm:$0xff]   ;;  %v795_v33 = vld [vmem:[#allocation7 + $0xa0] ss:$8 sps:$4 sm:$0xff]   ;;  %v796_v34 = vld [vmem:[#allocation7 + $0x94] ss:$8 sps:$4 sm:$0xff]  }
  0x32   :  { %v798_v35 = vld [vmem:[#allocation7 + $0x90] ss:$8 sps:$4 sm:$0xff]   ;;  %v799_v36 = vld [vmem:[#allocation7 + $0x84] ss:$8 sps:$4 sm:$0xff]   ;;  %v801_v37 = vld [vmem:[#allocation7 + $0x80] ss:$8 sps:$4 sm:$0xff]  }
  0x33   :  { %v75_v40 = vld [vmem:[#allocation2 + $0x80] sm:$0xff]  ;;  %v77_v41 = vld [vmem:[#allocation2 + $0x90] sm:$0xff]  ;;  %v64_v42 = vld [vmem:[#allocation2 + $0x28] sm:$0xff]  ;;  %v142_v17 = vshrl.u32 %v141_v16, 7 }
  0x34   :  { %318 = vmatpush1.bf16.msra.mxu0 %v765_v7  ;;  %733 = vmatpush1.bf16.msra.mxu1 %v765_v7  ;;  %v66_v43 = vld [vmem:[#allocation2 + $0x38] sm:$0xff]  ;;  %v80_v44 = vld [vmem:[#allocation2 + $0xa8] sm:$0xff]  ;;  %v99_v47 = vpack.c.bf16 %v77_v41, %v75_v40  ;;  %v63_v50 = vld [vmem:[#allocation2 + $0x20] sm:$0xff] }
  0x35   :  { %319 = vmatprep.subr.bf16.mxu0 %v766_v8  ;;  %718 = vmatprep.subr.bf16.mxu1 %v766_v8  ;;  %v82_v45 = vld [vmem:[#allocation2 + $0xb8] sm:$0xff]  ;;  %v94_v48 = vpack.c.bf16 %v66_v43, %v64_v42  ;;  %v65_v51 = vld [vmem:[#allocation2 + $0x30] sm:$0xff]  ;;  %v79_v52 = vld [vmem:[#allocation2 + $0xa0] sm:$0xff] }
  0x36   :  { %v102_v49 = vpack.c.bf16 %v82_v45, %v80_v44  ;;  %v81_v53 = vld [vmem:[#allocation2 + $0xb0] sm:$0xff]  ;;  %v68_v54 = vld [vmem:[#allocation2 + $0x48] sm:$0xff]  ;;  %v70_v55 = vld [vmem:[#allocation2 + $0x58] sm:$0xff]  ;;  %v93_v58 = vpack.c.bf16 %v65_v51, %v63_v50 }
  0x37   :  { %v84_v56 = vld [vmem:[#allocation2 + $0xc8] sm:$0xff]  ;;  %v86_v57 = vld [vmem:[#allocation2 + $0xd8] sm:$0xff]  ;;  %v101_v59 = vpack.c.bf16 %v81_v53, %v79_v52  ;;  %v96_v60 = vpack.c.bf16 %v70_v55, %v68_v54  ;;  %v67_v62 = vld [vmem:[#allocation2 + $0x40] sm:$0xff] }
  0x38   :  { %320 = vmatpush1.bf16.msra.mxu0 %v768_v9  ;;  %734 = vmatpush1.bf16.msra.mxu1 %v768_v9  ;;  %v104_v61 = vpack.c.bf16 %v86_v57, %v84_v56  ;;  %v69_v63 = vld [vmem:[#allocation2 + $0x50] sm:$0xff]  ;;  %v83_v0 = vld [vmem:[#allocation2 + $0xc0] sm:$0xff]  ;;  %v72_v2 = vld [vmem:[#allocation2 + $0x68] sm:$0xff] }
  0x39   :  { %321 = vmatprep.subr.bf16.mxu0 %v769_v10  ;;  %719 = vmatprep.subr.bf16.mxu1 %v769_v10  ;;  %v85_v1 = vld [vmem:[#allocation2 + $0xd0] sm:$0xff]  ;;  %v74_v3 = vld [vmem:[#allocation2 + $0x78] sm:$0xff]  ;;  %v88_v4 = vld [vmem:[#allocation2 + $0xe8] sm:$0xff]  ;;  %v95_v6 = vpack.c.bf16 %v69_v63, %v67_v62 }
  0x3a   :  { %v90_v5 = vld [vmem:[#allocation2 + $0xf8] sm:$0xff]  ;;  %v103_v7 = vpack.c.bf16 %v85_v1, %v83_v0  ;;  %v98_v8 = vpack.c.bf16 %v74_v3, %v72_v2  ;;  %v71_v10 = vld [vmem:[#allocation2 + $0x60] sm:$0xff]  ;;  %v89_v13 = vld [vmem:[#allocation2 + $0xf0] sm:$0xff] }
  0x3b   :  { %v106_v9 = vpack.c.bf16 %v90_v5, %v88_v4  ;;  %v139_v19 = vld [vmem:[%s981_s3] sm:$0x3]  ;;  %v474_v50 = vld [vmem:[#allocation5 + $0x90] sm:$0xff]  ;;  %v459_v55 = vld [vmem:[#allocation5 + $0x18] sm:$0xff]  ;;  %s895_s3 = smov [#allocation8]  }
  0x3c   :  { %322 = vmatpush1.bf16.msra.mxu0 %v771_v11  ;;  %735 = vmatpush1.bf16.msra.mxu1 %v771_v11  ;;  %v73_v11 = vld [vmem:[#allocation2 + $0x70] sm:$0xff]  ;;  %v475_v56 = vld [vmem:[#allocation5 + $0x98] sm:$0xff]  ;;  %s637_s7 = sshll.u32 %s895_s3, 4  ;;  %s638_s7 = int_to_ptr.vmem [resolvable:$true] %s637_s7 }
  0x3d   :  { %323 = vmatprep.subr.bf16.mxu0 %v772_v12  ;;  %720 = vmatprep.subr.bf16.mxu1 %v772_v12  ;;  %v87_v12 = vld [vmem:[#allocation2 + $0xe0] sm:$0xff]  ;;  %v97_v14 = vpack.c.bf16 %v73_v11, %v71_v10  ;;  %s862_s8 = scalar_lea.vmem %s638_s7, 2048  ;;  %p867_p2 = scmp.lt.s32.totalorder %s638_s7, %s638_s7 }
  0x3e   :  { %v105_v15 = vpack.c.bf16 %v89_v13, %v87_v12  ;;  %v461_v13 = vld [vmem:[#allocation5 + $0x28] sm:$0xff]  ;;  %p863_p1 = scmp.ne.s32.totalorder %s638_s7, %s862_s8  ;;  %p868_p3 = scmp.lt.s32.totalorder %s862_s8, %s862_s8 }
  0x40   :  { %324 = vmatpush1.bf16.msra.mxu0 %v774_v18  ;;  %736 = vmatpush1.bf16.msra.mxu1 %v774_v18  ;;  %v143_v18 = vsub.s32 0, %v142_v17  ;;  %p869_p4 = por %p868_p3, %p867_p2 }
  0x41   :  { %325 = vmatprep.subr.bf16.mxu0 %v775_v20  ;;  %721 = vmatprep.subr.bf16.mxu1 %v775_v20  ;;  %v147_v20 = vsub.s32 1, %v142_v17 }
  0x42   :  { %p870_p5 = pnand %p869_p4, %p863_p1 }
  0x44   :  { %326 = vmatpush1.bf16.msra.mxu0 %v777_v21  ;;  %737 = vmatpush1.bf16.msra.mxu1 %v777_v21  ;;  %v936_v21 = vrot.slane %v139_v19, %v143_v18 }
  0x45   :  { %327 = vmatprep.subr.bf16.mxu0 %v778_v22  ;;  %722 = vmatprep.subr.bf16.mxu1 %v778_v22  ;;  %v938_v22 = vrot.slane %v139_v19, %v147_v20 }
  0x48   :  { %328 = vmatpush2.bf16.msra.mxu0 %v780_v23  ;;  %738 = vmatpush2.bf16.msra.mxu1 %v780_v23 }
  0x49   :  { %329 = vmatprep.subr.bf16.mxu0 %v781_v24  ;;  %723 = vmatprep.subr.bf16.mxu1 %v781_v24 }
  0x4c   :  { %330 = vmatpush2.bf16.msra.mxu0 %v783_v25  ;;  %739 = vmatpush2.bf16.msra.mxu1 %v783_v25 }
  0x4d   :  { %331 = vmatprep.subr.bf16.mxu0 %v784_v26  ;;  %724 = vmatprep.subr.bf16.mxu1 %v784_v26 }
  0x50   :  { %332 = vmatpush2.bf16.msra.mxu0 %v786_v27  ;;  %740 = vmatpush2.bf16.msra.mxu1 %v786_v27 }
  0x51   :  { %333 = vmatprep.subr.bf16.mxu0 %v787_v28  ;;  %725 = vmatprep.subr.bf16.mxu1 %v787_v28 }
  0x54   :  { %334 = vmatpush2.bf16.msra.mxu0 %v789_v29  ;;  %741 = vmatpush2.bf16.msra.mxu1 %v789_v29 }
  0x55   :  { %335 = vmatprep.subr.bf16.mxu0 %v790_v30  ;;  %726 = vmatprep.subr.bf16.mxu1 %v790_v30  ;;  %v456_v30 = vld [vmem:[#allocation5] sm:$0xff] }
  0x58   :  { %336 = vmatpush2.bf16.msra.mxu0 %v792_v31  ;;  %742 = vmatpush2.bf16.msra.mxu1 %v792_v31 }
  0x59   :  { %337 = vmatprep.subr.bf16.mxu0 %v793_v32  ;;  %727 = vmatprep.subr.bf16.mxu1 %v793_v32  ;;  %v472_v32 = vld [vmem:[#allocation5 + $0x80] sm:$0xff] }
  0x5c   :  { %338 = vmatpush2.bf16.msra.mxu0 %v795_v33  ;;  %743 = vmatpush2.bf16.msra.mxu1 %v795_v33 }
  0x5d   :  { %339 = vmatprep.subr.bf16.mxu0 %v796_v34  ;;  %728 = vmatprep.subr.bf16.mxu1 %v796_v34 }
  0x60   :  { %340 = vmatpush2.bf16.msra.mxu0 %v798_v35  ;;  %744 = vmatpush2.bf16.msra.mxu1 %v798_v35  ;;  %v457_v35 = vld [vmem:[#allocation5 + $0x8] sm:$0xff] }
  0x61   :  { %341 = vmatprep.subr.bf16.mxu0 %v799_v36  ;;  %729 = vmatprep.subr.bf16.mxu1 %v799_v36  ;;  %v473_v36 = vld [vmem:[#allocation5 + $0x88] sm:$0xff] }
  0x64   :  { %342 = vmatpush2.bf16.msra.mxu0 %v801_v37  ;;  %745 = vmatpush2.bf16.msra.mxu1 %v801_v37 }
  0x67   :  { %344 = vmatmul.mubr.bf16.vlgmr.msra.gmra.mxu0 %v91_v46  ;;  %384 = vmatmul.mubr.bf16.vlgmr.msra.gmra.mxu1 %v99_v47 }
  0x68   :  { %353 = vmatprep.mubr.bf16.mxu0 %v94_v48  ;;  %393 = vmatprep.mubr.bf16.mxu1 %v102_v49  ;;  %v458_v49 = vld [vmem:[#allocation5 + $0x10] sm:$0xff] }
  0x6f   :  { %354 = vmatmul.mubr.bf16.gmra.mxu0 %v93_v58  ;;  %394 = vmatmul.mubr.bf16.gmra.mxu1 %v101_v59 }
  0x70   :  { %363 = vmatprep.mubr.bf16.mxu0 %v96_v60  ;;  %403 = vmatprep.mubr.bf16.mxu1 %v104_v61 }
  0x77   :  { %364 = vmatmul.mubr.bf16.gmra.mxu0 %v95_v6  ;;  %404 = vmatmul.mubr.bf16.gmra.mxu1 %v103_v7  ;;  %v460_v7 = vld [vmem:[#allocation5 + $0x20] sm:$0xff] }
  0x78   :  { %373 = vmatprep.mubr.bf16.mxu0 %v98_v8  ;;  %413 = vmatprep.mubr.bf16.mxu1 %v106_v9  ;;  %v476_v8 = vld [vmem:[#allocation5 + $0xa0] sm:$0xff] }
  0x7f   :  { %374 = vmatmul.mubr.bf16.gmra.mxu0 %v97_v14  ;;  %414 = vmatmul.mubr.bf16.gmra.mxu1 %v105_v15  ;;  %v477_v14 = vld [vmem:[#allocation5 + $0xa8] sm:$0xff] }
 0x127   :  { %v345_v23 = vpop.f32.mrf.mxu0  ;;  %v385_v24 = vpop.f32.mrf.mxu1 }
 0x128   :  { %v346_v25 = vadd.f32 %v345_v23, %v936_v21  ;;  %v386_v26 = vadd.f32 %v385_v24, %v936_v21 }
 0x129   :  { %v347_v27 = vpop.f32.mrf.mxu0  ;;  %v387_v28 = vpop.f32.mrf.mxu1 }
 0x12a   :  { %v424_v29 = vmax.f32 %v346_v25, 0.0  ;;  %v440_v31 = vmax.f32 %v386_v26, 0.0  ;;  %v348_v33 = vadd.f32 %v347_v27, %v938_v22  ;;  %v388_v34 = vadd.f32 %v387_v28, %v938_v22 }
 0x12b   :  { %v349_v37 = vpop.f32.mrf.mxu0  ;;  %v389_v38 = vpop.f32.mrf.mxu1 }
 0x12c   :  { %v425_v39 = vmax.f32 %v348_v33, 0.0  ;;  %v441_v40 = vmax.f32 %v388_v34, 0.0  ;;  %v488_v41 = vsub.f32 %v456_v30, %v424_v29  ;;  %v504_v42 = vsub.f32 %v472_v32, %v440_v31  ;;  %v462_v31 = vld [vmem:[#allocation5 + $0x30] sm:$0xff] }
 0x12d   :  { %v350_v43 = vadd.f32 %v349_v37, %v936_v21  ;;  %v390_v44 = vadd.f32 %v389_v38, %v936_v21  ;;  %v351_v45 = vpop.f32.mrf.mxu0  ;;  %v391_v46 = vpop.f32.mrf.mxu1  ;;  %v478_v32 = vld [vmem:[#allocation5 + $0xb0] sm:$0xff]  ;;  %v463_v37 = vld [vmem:[#allocation5 + $0x38] sm:$0xff] }
 0x12e   :  { %v489_v47 = vsub.f32 %v457_v35, %v425_v39  ;;  %v505_v48 = vsub.f32 %v473_v36, %v441_v40  ;;  %v352_v51 = vadd.f32 %v351_v45, %v938_v22  ;;  %v392_v52 = vadd.f32 %v391_v46, %v938_v22  ;;  %v479_v38 = vld [vmem:[#allocation5 + $0xb8] sm:$0xff] }
 0x12f   :  { %v426_v53 = vmax.f32 %v350_v43, 0.0  ;;  %v442_v54 = vmax.f32 %v390_v44, 0.0  ;;  %v355_v57 = vpop.f32.mrf.mxu0  ;;  %v395_v58 = vpop.f32.mrf.mxu1 }
 0x130   :  { %v698_v59 = vpack.c.bf16 %v489_v47, %v488_v41  ;;  %v706_v60 = vpack.c.bf16 %v505_v48, %v504_v42  ;;  %v427_v61 = vmax.f32 %v352_v51, 0.0  ;;  %v443_v62 = vmax.f32 %v392_v52, 0.0 }
 0x131   :  { %v490_v63 = vsub.f32 %v458_v49, %v426_v53  ;;  %v506_v0 = vsub.f32 %v474_v50, %v442_v54  ;;  %v356_v1 = vadd.f32 %v355_v57, %v936_v21  ;;  %v396_v2 = vadd.f32 %v395_v58, %v936_v21  ;;  %v357_v3 = vpop.f32.mrf.mxu0  ;;  %v397_v4 = vpop.f32.mrf.mxu1  ;;  %v464_v53 = vld [vmem:[#allocation5 + $0x40] sm:$0xff] }
 0x132   :  { %616 = vst [vmem:[#allocation8] sm:$0xff] %v698_v59  ;;  %624 = vst [vmem:[#allocation8 + $0x40] sm:$0xff] %v706_v60  ;;  %v491_v5 = vsub.f32 %v459_v55, %v427_v61  ;;  %v507_v6 = vsub.f32 %v475_v56, %v443_v62  ;;  %v358_v9 = vadd.f32 %v357_v3, %v938_v22  ;;  %v480_v54 = vld [vmem:[#allocation5 + $0xc0] sm:$0xff]  ;;  %v465_v59 = vld [vmem:[#allocation5 + $0x48] sm:$0xff] }
 0x133   :  { %v398_v10 = vadd.f32 %v397_v4, %v938_v22  ;;  %v428_v11 = vmax.f32 %v356_v1, 0.0  ;;  %v444_v12 = vmax.f32 %v396_v2, 0.0  ;;  %v359_v15 = vpop.f32.mrf.mxu0  ;;  %v399_v16 = vpop.f32.mrf.mxu1  ;;  %v481_v60 = vld [vmem:[#allocation5 + $0xc8] sm:$0xff] }
 0x134   :  { %v699_v17 = vpack.c.bf16 %v491_v5, %v490_v63  ;;  %v707_v18 = vpack.c.bf16 %v507_v6, %v506_v0  ;;  %v429_v19 = vmax.f32 %v358_v9, 0.0  ;;  %v360_v25 = vadd.f32 %v359_v15, %v936_v21 }
 0x135   :  { %v445_v20 = vmax.f32 %v398_v10, 0.0  ;;  %v492_v23 = vsub.f32 %v460_v7, %v428_v11  ;;  %v508_v24 = vsub.f32 %v476_v8, %v444_v12  ;;  %v400_v26 = vadd.f32 %v399_v16, %v936_v21  ;;  %v361_v27 = vpop.f32.mrf.mxu0  ;;  %v401_v28 = vpop.f32.mrf.mxu1  ;;  %v466_v11 = vld [vmem:[#allocation5 + $0x50] sm:$0xff] }
 0x136   :  { %617 = vst [vmem:[#allocation8 + $0x8] sm:$0xff] %v699_v17  ;;  %625 = vst [vmem:[#allocation8 + $0x48] sm:$0xff] %v707_v18  ;;  %v493_v29 = vsub.f32 %v461_v13, %v429_v19  ;;  %v362_v33 = vadd.f32 %v361_v27, %v938_v22  ;;  %v402_v34 = vadd.f32 %v401_v28, %v938_v22  ;;  %v430_v35 = vmax.f32 %v360_v25, 0.0  ;;  %v482_v12 = vld [vmem:[#allocation5 + $0xd0] sm:$0xff]  ;;  %v467_v17 = vld [vmem:[#allocation5 + $0x58] sm:$0xff] }
 0x137   :  { %v509_v30 = vsub.f32 %v477_v14, %v445_v20  ;;  %v446_v36 = vmax.f32 %v400_v26, 0.0  ;;  %v365_v39 = vpop.f32.mrf.mxu0  ;;  %v405_v40 = vpop.f32.mrf.mxu1  ;;  %v483_v18 = vld [vmem:[#allocation5 + $0xd8] sm:$0xff] }
 0x138   :  { %v700_v41 = vpack.c.bf16 %v493_v29, %v492_v23  ;;  %v431_v43 = vmax.f32 %v362_v33, 0.0  ;;  %v447_v44 = vmax.f32 %v402_v34, 0.0  ;;  %v494_v45 = vsub.f32 %v462_v31, %v430_v35  ;;  %v468_v35 = vld [vmem:[#allocation5 + $0x60] sm:$0xff] }
 0x139   :  { %v708_v42 = vpack.c.bf16 %v509_v30, %v508_v24  ;;  %v510_v46 = vsub.f32 %v478_v32, %v446_v36  ;;  %v366_v47 = vadd.f32 %v365_v39, %v936_v21  ;;  %v406_v48 = vadd.f32 %v405_v40, %v936_v21  ;;  %v367_v49 = vpop.f32.mrf.mxu0  ;;  %v407_v50 = vpop.f32.mrf.mxu1  ;;  %v484_v36 = vld [vmem:[#allocation5 + $0xe0] sm:$0xff] }
 0x13a   :  { %618 = vst [vmem:[#allocation8 + $0x10] sm:$0xff] %v700_v41  ;;  %v495_v51 = vsub.f32 %v463_v37, %v431_v43  ;;  %v511_v52 = vsub.f32 %v479_v38, %v447_v44  ;;  %v368_v55 = vadd.f32 %v367_v49, %v938_v22  ;;  %v408_v56 = vadd.f32 %v407_v50, %v938_v22  ;;  %v469_v41 = vld [vmem:[#allocation5 + $0x68] sm:$0xff] }
 0x13b   :  { %626 = vst [vmem:[#allocation8 + $0x50] sm:$0xff] %v708_v42  ;;  %v432_v57 = vmax.f32 %v366_v47, 0.0  ;;  %v448_v58 = vmax.f32 %v406_v48, 0.0  ;;  %v369_v61 = vpop.f32.mrf.mxu0  ;;  %v409_v62 = vpop.f32.mrf.mxu1  ;;  %v485_v42 = vld [vmem:[#allocation5 + $0xe8] sm:$0xff] }
 0x13c   :  { %v701_v63 = vpack.c.bf16 %v495_v51, %v494_v45  ;;  %v709_v0 = vpack.c.bf16 %v511_v52, %v510_v46  ;;  %v433_v1 = vmax.f32 %v368_v55, 0.0  ;;  %v449_v2 = vmax.f32 %v408_v56, 0.0 }
 0x13d   :  { %v496_v3 = vsub.f32 %v464_v53, %v432_v57  ;;  %v512_v4 = vsub.f32 %v480_v54, %v448_v58  ;;  %v370_v5 = vadd.f32 %v369_v61, %v936_v21  ;;  %v410_v6 = vadd.f32 %v409_v62, %v936_v21  ;;  %v371_v7 = vpop.f32.mrf.mxu0  ;;  %v411_v8 = vpop.f32.mrf.mxu1  ;;  %v470_v57 = vld [vmem:[#allocation5 + $0x70] sm:$0xff] }
 0x13e   :  { %619 = vst [vmem:[#allocation8 + $0x18] sm:$0xff] %v701_v63  ;;  %627 = vst [vmem:[#allocation8 + $0x58] sm:$0xff] %v709_v0  ;;  %v497_v9 = vsub.f32 %v465_v59, %v433_v1  ;;  %v513_v10 = vsub.f32 %v481_v60, %v449_v2  ;;  %v372_v13 = vadd.f32 %v371_v7, %v938_v22  ;;  %v486_v62 = vld [vmem:[#allocation5 + $0xf0] sm:$0xff]  ;;  %v471_v63 = vld [vmem:[#allocation5 + $0x78] sm:$0xff] }
 0x13f   :  { %v412_v14 = vadd.f32 %v411_v8, %v938_v22  ;;  %v434_v15 = vmax.f32 %v370_v5, 0.0  ;;  %v450_v16 = vmax.f32 %v410_v6, 0.0  ;;  %v375_v19 = vpop.f32.mrf.mxu0  ;;  %v415_v20 = vpop.f32.mrf.mxu1  ;;  %v487_v0 = vld [vmem:[#allocation5 + $0xf8] sm:$0xff] }
 0x140   :  { %v702_v23 = vpack.c.bf16 %v497_v9, %v496_v3  ;;  %v710_v24 = vpack.c.bf16 %v513_v10, %v512_v4  ;;  %v435_v25 = vmax.f32 %v372_v13, 0.0  ;;  %v376_v29 = vadd.f32 %v375_v19, %v936_v21 }
 0x141   :  { %v451_v26 = vmax.f32 %v412_v14, 0.0  ;;  %v498_v27 = vsub.f32 %v466_v11, %v434_v15  ;;  %v514_v28 = vsub.f32 %v482_v12, %v450_v16  ;;  %v416_v30 = vadd.f32 %v415_v20, %v936_v21  ;;  %v377_v31 = vpop.f32.mrf.mxu0  ;;  %v417_v32 = vpop.f32.mrf.mxu1 }
 0x142   :  { %620 = vst [vmem:[#allocation8 + $0x20] sm:$0xff] %v702_v23  ;;  %628 = vst [vmem:[#allocation8 + $0x60] sm:$0xff] %v710_v24  ;;  %v499_v33 = vsub.f32 %v467_v17, %v435_v25  ;;  %v378_v37 = vadd.f32 %v377_v31, %v938_v22  ;;  %v418_v38 = vadd.f32 %v417_v32, %v938_v22  ;;  %v436_v39 = vmax.f32 %v376_v29, 0.0 }
 0x143   :  { %v515_v34 = vsub.f32 %v483_v18, %v451_v26  ;;  %v452_v40 = vmax.f32 %v416_v30, 0.0  ;;  %v379_v43 = vpop.f32.mrf.mxu0  ;;  %v419_v44 = vpop.f32.mrf.mxu1 }
 0x144   :  { %v703_v45 = vpack.c.bf16 %v499_v33, %v498_v27  ;;  %v437_v47 = vmax.f32 %v378_v37, 0.0  ;;  %v453_v48 = vmax.f32 %v418_v38, 0.0  ;;  %v500_v49 = vsub.f32 %v468_v35, %v436_v39 }
 0x145   :  { %v711_v46 = vpack.c.bf16 %v515_v34, %v514_v28  ;;  %v516_v50 = vsub.f32 %v484_v36, %v452_v40  ;;  %v380_v51 = vadd.f32 %v379_v43, %v936_v21  ;;  %v420_v52 = vadd.f32 %v419_v44, %v936_v21  ;;  %v381_v53 = vpop.f32.mrf.mxu0  ;;  %v421_v54 = vpop.f32.mrf.mxu1 }
 0x146   :  { %621 = vst [vmem:[#allocation8 + $0x28] sm:$0xff] %v703_v45  ;;  %v501_v55 = vsub.f32 %v469_v41, %v437_v47  ;;  %v517_v56 = vsub.f32 %v485_v42, %v453_v48  ;;  %v382_v58 = vadd.f32 %v381_v53, %v938_v22  ;;  %v422_v59 = vadd.f32 %v421_v54, %v938_v22 }
 0x147   :  { %629 = vst [vmem:[#allocation8 + $0x68] sm:$0xff] %v711_v46  ;;  %v438_v60 = vmax.f32 %v380_v51, 0.0  ;;  %v454_v61 = vmax.f32 %v420_v52, 0.0 }
 0x148   :  { %v704_v1 = vpack.c.bf16 %v501_v55, %v500_v49  ;;  %v712_v2 = vpack.c.bf16 %v517_v56, %v516_v50  ;;  %v439_v3 = vmax.f32 %v382_v58, 0.0  ;;  %v455_v21 = vmax.f32 %v422_v59, 0.0 }
 0x149   :  { %v502_v4 = vsub.f32 %v470_v57, %v438_v60  ;;  %v518_v5 = vsub.f32 %v486_v62, %v454_v61 }
 0x14a   :  { %622 = vst [vmem:[#allocation8 + $0x30] sm:$0xff] %v704_v1  ;;  %630 = vst [vmem:[#allocation8 + $0x70] sm:$0xff] %v712_v2  ;;  %v503_v6 = vsub.f32 %v471_v63, %v439_v3  ;;  %v519_v7 = vsub.f32 %v487_v0, %v455_v21 }
 0x14c   :  { %v705_v8 = vpack.c.bf16 %v503_v6, %v502_v4  ;;  %v713_v9 = vpack.c.bf16 %v519_v7, %v518_v5 }
 0x14e   :  { %623 = vst [vmem:[#allocation8 + $0x38] sm:$0xff] %v705_v8  ;;  %631 = vst [vmem:[#allocation8 + $0x78] sm:$0xff] %v713_v9 }
 0x14f   :  { %873 = shalt.err (!%p870_p5)
}
 0x150   :  { %643 = dma.vmem_to_hbm [thread:$0]  %s638_s7, 2048, %s982_s4, [#allocation4], %s893_s1, %s893_s1, %s894_s30  }
 0x151   :  { %886 = dma.done.wait [#allocation4], 2048  }
 0x152   :  { %887 = vsyncadd [#allocation4], 4294965248 }
 0x153   :  { %647 = vsyncpa [#allocation3], 1 }
 0x154   :  { %648 = vsyncpa [#allocation6], 1 }
 0x155   :  { %649 = vsyncpa [#allocation4], 1 }

</bundles_post_ra>
